<compile_context>
chip_gen: v7x
topology: tpu7x:2x2x1
jax: 0.10.0
libtpu: 0.0.40
codegen_flags: <defaults>
</compile_context>

<pallas_src>
import functools
import math

import jax
import jax.numpy as jnp
from jax.experimental import pallas as pl
from jax.experimental.pallas import tpu as pltpu


# ----------------------------------------------------------------------------
# Kernel
# ----------------------------------------------------------------------------
def _pinn_mlp_kernel(n_layers, *refs):
    """refs = (xT, W1, b1, ..., Wn, bn, outT).

    Feature-major: activations are (features, tm); the lane axis (last dim)
    is the batch tile, so all elementwise work and stores are lane-dense.
    """
    x_ref = refs[0]
    wb_refs = refs[1:1 + 2 * n_layers]
    o_ref = refs[1 + 2 * n_layers]

    h = x_ref[...]                                       # (in_dim, tm)

    # Hidden layers with tanh activation (fc1 + hidden_layers).
    # Input normalization is already folded into W1 / b1 on the host.
    for li in range(n_layers - 1):
        w = wb_refs[2 * li][...]                         # (out_f, in_f)
        b = wb_refs[2 * li + 1][...]                     # (out_f, 1)
        h = jnp.tanh(jnp.dot(w, h, preferred_element_type=jnp.float32) + b)

    # Output layer (fc2), no activation.
    w = wb_refs[2 * (n_layers - 1)][...]
    b = wb_refs[2 * (n_layers - 1) + 1][...]
    o_ref[...] = (jnp.dot(w, h, preferred_element_type=jnp.float32) + b
                  ).astype(o_ref.dtype)


# ----------------------------------------------------------------------------
# Wrapper
# ----------------------------------------------------------------------------
def pinn_forward(x, lb, ub, weights, biases, *, tm=256):
    """PINN MLP forward pass with a feature-major Pallas TPU kernel.

    Args:
      x:       (N, input_size) float32 collocation points
      lb, ub:  (input_size,) float32 domain bounds
      weights: list of (out_features, in_features) float32 matrices
               (PyTorch nn.Linear.weight convention)
      biases:  list of (out_features,) float32 vectors
      tm:      batch tile size; multiple of 128 (256 preferred on v6e/v7x)
    """
    n, in_dim = x.shape
    out_dim = weights[-1].shape[0]
    n_layers = len(weights)

    lb = lb.astype(jnp.float32)
    ub = ub.astype(jnp.float32)
    inv_range = 1.0 / (ub - lb)

    # Fold the affine input normalization (x - lb) * inv_range into layer 1.
    w1 = weights[0].astype(jnp.float32) * inv_range[None, :]
    b1 = biases[0].astype(jnp.float32) - w1 @ lb
    ws = [w1] + [w.astype(jnp.float32) for w in weights[1:]]
    bs = [b1] + [b.astype(jnp.float32) for b in biases[1:]]

    # Pad batch to a tile multiple; transpose to feature-major (in_dim, n_pad).
    n_tiles = pl.cdiv(n, tm)
    n_pad = n_tiles * tm
    x_t = jnp.pad(x.astype(jnp.float32).T, ((0, 0), (0, n_pad - n)))

    # BlockSpecs: x / out tiled over batch (lane axis), params full & constant.
    in_specs = [pl.BlockSpec((in_dim, tm), lambda i: (0, i))]
    flat_params = []
    for w, b in zip(ws, bs):
        b2 = b.reshape(-1, 1)                            # (out_f, 1) column
        in_specs.append(pl.BlockSpec(w.shape, lambda i: (0, 0)))
        in_specs.append(pl.BlockSpec(b2.shape, lambda i: (0, 0)))
        flat_params += [w, b2]

    out_spec = pl.BlockSpec((out_dim, tm), lambda i: (0, i))

    kernel = functools.partial(_pinn_mlp_kernel, n_layers)

    out_t = pl.pallas_call(
        kernel,
        out_shape=jax.ShapeDtypeStruct((out_dim, n_pad), jnp.float32),
        grid_spec=pltpu.PrefetchScalarGridSpec(
            num_scalar_prefetch=0,
            grid=(n_tiles,),
            in_specs=in_specs,
            out_specs=out_spec,
        ),
        compiler_params=pltpu.CompilerParams(
            dimension_semantics=("parallel",)),
    )(x_t, *flat_params)

    # Back to the module's (N, output_size) interface, dropping batch padding.
    return out_t[:, :n].T


# ----------------------------------------------------------------------------
# Deterministic parameter initialization (mirrors PINN_Net.__init__ shapes)
# ----------------------------------------------------------------------------
def xavier_uniform(key, fan_in, fan_out):
    limit = math.sqrt(6.0 / (fan_in + fan_out))
    # PyTorch nn.Linear.weight layout: (out_features, in_features).
    return jax.random.uniform(key, (fan_out, fan_in), jnp.float32, -limit, limit)


def linear_bias(key, fan_in, fan_out):
    # PyTorch default Linear bias init: U(-1/sqrt(fan_in), 1/sqrt(fan_in))
    bound = 1.0 / math.sqrt(fan_in)
    return jax.random.uniform(key, (fan_out,), jnp.float32, -bound, bound)


def build_params(key, input_size, hidden_sizes, output_size):
    dims = [input_size] + list(hidden_sizes) + [output_size]
    weights, biases = [], []
    for i in range(len(dims) - 1):
        key, kw, kb = jax.random.split(key, 3)
        weights.append(xavier_uniform(kw, dims[i], dims[i + 1]))
        biases.append(linear_bias(kb, dims[i], dims[i + 1]))
    return weights, biases


def reference_forward(x, lb, ub, weights, biases):
    h = (x - lb) / (ub - lb)
    for w, b in zip(weights[:-1], biases[:-1]):
        h = jnp.tanh(h @ w.T + b)
    return h @ weights[-1].T + biases[-1]


# ----------------------------------------------------------------------------
if __name__ == "__main__":
    # PDE = 'Navier_Stokes' -> input_size=2, output_size=6
    input_size = 2
    output_size = 6
    hidden_sizes = [32, 32, 32]          # fc1 + 2 hidden layers + fc2
    ub = jnp.array([1.0, 1.0], jnp.float32)
    lb = jnp.array([-1.0, 0.0], jnp.float32)

    key = jax.random.PRNGKey(0)
    key, kx = jax.random.split(key)
    N = 512                              # batch of collocation points
    x = jax.random.uniform(kx, (N, input_size), jnp.float32,
                           minval=lb, maxval=ub)

    weights, biases = build_params(key, input_size, hidden_sizes, output_size)

    # Main run: tm=256 -> grid of 2 parallel steps (both v7x TCs get work).
    out = pinn_forward(x, lb, ub, weights, biases, tm=256)
    out = jax.block_until_ready(out)

    ref = reference_forward(x, lb, ub, weights, biases)
    assert out.shape == (N, output_size)
    assert jnp.allclose(out, ref, atol=1e-4, rtol=1e-4), "mismatch vs reference"

    # Tail-handling check: batch not divisible by the tile (padded internally).
    N2 = 300
    key, kx2 = jax.random.split(key)
    x2 = jax.random.uniform(kx2, (N2, input_size), jnp.float32,
                            minval=lb, maxval=ub)
    out2 = jax.block_until_ready(pinn_forward(x2, lb, ub, weights, biases,
                                              tm=256))
    ref2 = reference_forward(x2, lb, ub, weights, biases)
    assert out2.shape == (N2, output_size)
    assert jnp.allclose(out2, ref2, atol=1e-4, rtol=1e-4), "tail mismatch"

    print("KERNEL_OK")
</pallas_src>

<mosaic_0001>
module attributes {stable_mosaic.version = 11 : i64} {
  func.func @_pinn_mlp_kernel(%arg0: i32, %arg1: memref<2x256xf32, #tpu.memory_space<vmem>>, %arg2: memref<32x2xf32, #tpu.memory_space<vmem>>, %arg3: memref<32x1xf32, #tpu.memory_space<vmem>>, %arg4: memref<32x32xf32, #tpu.memory_space<vmem>>, %arg5: memref<32x1xf32, #tpu.memory_space<vmem>>, %arg6: memref<32x32xf32, #tpu.memory_space<vmem>>, %arg7: memref<32x1xf32, #tpu.memory_space<vmem>>, %arg8: memref<6x32xf32, #tpu.memory_space<vmem>>, %arg9: memref<6x1xf32, #tpu.memory_space<vmem>>, %arg10: memref<6x256xf32, #tpu.memory_space<vmem>>) attributes {dimension_semantics = [#tpu.dimension_semantics<parallel>], iteration_bounds = array<i64: 2>, scalar_prefetch = 0 : i64, scratch_operands = 0 : i64, tpu.core_type = #tpu.core_type<tc>, window_params = [{transform_indices = @transform_0, window_bounds = array<i64: 2, 256>}, {pipeline_mode = #tpu.pipeline_mode<synchronous>, transform_indices = @transform_1, window_bounds = array<i64: 32, 2>}, {pipeline_mode = #tpu.pipeline_mode<synchronous>, transform_indices = @transform_2, window_bounds = array<i64: 32, 1>}, {pipeline_mode = #tpu.pipeline_mode<synchronous>, transform_indices = @transform_3, window_bounds = array<i64: 32, 32>}, {pipeline_mode = #tpu.pipeline_mode<synchronous>, transform_indices = @transform_4, window_bounds = array<i64: 32, 1>}, {pipeline_mode = #tpu.pipeline_mode<synchronous>, transform_indices = @transform_5, window_bounds = array<i64: 32, 32>}, {pipeline_mode = #tpu.pipeline_mode<synchronous>, transform_indices = @transform_6, window_bounds = array<i64: 32, 1>}, {pipeline_mode = #tpu.pipeline_mode<synchronous>, transform_indices = @transform_7, window_bounds = array<i64: 6, 32>}, {pipeline_mode = #tpu.pipeline_mode<synchronous>, transform_indices = @transform_8, window_bounds = array<i64: 6, 1>}, {transform_indices = @transform_9, window_bounds = array<i64: 6, 256>}]} {
    %c0 = arith.constant 0 : index
    %c0_0 = arith.constant 0 : index
    %0 = vector.load %arg1[%c0, %c0_0] : memref<2x256xf32, #tpu.memory_space<vmem>>, vector<2x256xf32>
    %c0_1 = arith.constant 0 : index
    %c0_2 = arith.constant 0 : index
    %1 = vector.load %arg2[%c0_1, %c0_2] : memref<32x2xf32, #tpu.memory_space<vmem>>, vector<32x2xf32>
    %c0_3 = arith.constant 0 : index
    %c0_4 = arith.constant 0 : index
    %2 = vector.load %arg3[%c0_3, %c0_4] : memref<32x1xf32, #tpu.memory_space<vmem>>, vector<32x1xf32>
    %cst = arith.constant dense<0.000000e+00> : vector<32x256xf32>
    %3 = tpu.matmul %1, %0, %cst {dimension_numbers = #tpu.dot_dimension_numbers<[1], [0], [0], [1], [0, 0, 1, 1], [], []>} : vector<32x2xf32>, vector<2x256xf32>, vector<32x256xf32> -> vector<32x256xf32>
    %4 = vector.broadcast %2 : vector<32x1xf32> to vector<32x256xf32>
    %5 = arith.addf %3, %4 : vector<32x256xf32>
    %6 = math.tanh %5 : vector<32x256xf32>
    %c0_5 = arith.constant 0 : index
    %c0_6 = arith.constant 0 : index
    %7 = vector.load %arg4[%c0_5, %c0_6] : memref<32x32xf32, #tpu.memory_space<vmem>>, vector<32x32xf32>
    %c0_7 = arith.constant 0 : index
    %c0_8 = arith.constant 0 : index
    %8 = vector.load %arg5[%c0_7, %c0_8] : memref<32x1xf32, #tpu.memory_space<vmem>>, vector<32x1xf32>
    %cst_9 = arith.constant dense<0.000000e+00> : vector<32x256xf32>
    %9 = tpu.matmul %7, %6, %cst_9 {dimension_numbers = #tpu.dot_dimension_numbers<[1], [0], [0], [1], [0, 0, 1, 1], [], []>} : vector<32x32xf32>, vector<32x256xf32>, vector<32x256xf32> -> vector<32x256xf32>
    %10 = vector.broadcast %8 : vector<32x1xf32> to vector<32x256xf32>
    %11 = arith.addf %9, %10 : vector<32x256xf32>
    %12 = math.tanh %11 : vector<32x256xf32>
    %c0_10 = arith.constant 0 : index
    %c0_11 = arith.constant 0 : index
    %13 = vector.load %arg6[%c0_10, %c0_11] : memref<32x32xf32, #tpu.memory_space<vmem>>, vector<32x32xf32>
    %c0_12 = arith.constant 0 : index
    %c0_13 = arith.constant 0 : index
    %14 = vector.load %arg7[%c0_12, %c0_13] : memref<32x1xf32, #tpu.memory_space<vmem>>, vector<32x1xf32>
    %cst_14 = arith.constant dense<0.000000e+00> : vector<32x256xf32>
    %15 = tpu.matmul %13, %12, %cst_14 {dimension_numbers = #tpu.dot_dimension_numbers<[1], [0], [0], [1], [0, 0, 1, 1], [], []>} : vector<32x32xf32>, vector<32x256xf32>, vector<32x256xf32> -> vector<32x256xf32>
    %16 = vector.broadcast %14 : vector<32x1xf32> to vector<32x256xf32>
    %17 = arith.addf %15, %16 : vector<32x256xf32>
    %18 = math.tanh %17 : vector<32x256xf32>
    %c0_15 = arith.constant 0 : index
    %c0_16 = arith.constant 0 : index
    %19 = vector.load %arg8[%c0_15, %c0_16] : memref<6x32xf32, #tpu.memory_space<vmem>>, vector<6x32xf32>
    %c0_17 = arith.constant 0 : index
    %c0_18 = arith.constant 0 : index
    %20 = vector.load %arg9[%c0_17, %c0_18] : memref<6x1xf32, #tpu.memory_space<vmem>>, vector<6x1xf32>
    %cst_19 = arith.constant dense<0.000000e+00> : vector<6x256xf32>
    %21 = tpu.matmul %19, %18, %cst_19 {dimension_numbers = #tpu.dot_dimension_numbers<[1], [0], [0], [1], [0, 0, 1, 1], [], []>} : vector<6x32xf32>, vector<32x256xf32>, vector<6x256xf32> -> vector<6x256xf32>
    %22 = vector.broadcast %20 : vector<6x1xf32> to vector<6x256xf32>
    %23 = arith.addf %21, %22 : vector<6x256xf32>
    %c0_20 = arith.constant 0 : index
    %c0_21 = arith.constant 0 : index
    %24 = vector.load %arg10[%c0_20, %c0_21] : memref<6x256xf32, #tpu.memory_space<vmem>>, vector<6x256xf32>
    tpu.vector_store %arg10[%c0_20, %c0_21], %23 {strides = array<i32>} : memref<6x256xf32, #tpu.memory_space<vmem>>, vector<6x256xf32>,
    return
  }
  func.func @transform_0(%arg0: i32) -> (i32, i32) {
    %c0_i32 = arith.constant 0 : i32
    %c0_i32_0 = arith.constant 0 : i32
    return %c0_i32, %arg0 : i32, i32
  }
  func.func @transform_1(%arg0: i32) -> (i32, i32) {
    %c0_i32 = arith.constant 0 : i32
    %c0_i32_0 = arith.constant 0 : i32
    %c0_i32_1 = arith.constant 0 : i32
    return %c0_i32, %c0_i32_0 : i32, i32
  }
  func.func @transform_2(%arg0: i32) -> (i32, i32) {
    %c0_i32 = arith.constant 0 : i32
    %c0_i32_0 = arith.constant 0 : i32
    %c0_i32_1 = arith.constant 0 : i32
    return %c0_i32, %c0_i32_0 : i32, i32
  }
  func.func @transform_3(%arg0: i32) -> (i32, i32) {
    %c0_i32 = arith.constant 0 : i32
    %c0_i32_0 = arith.constant 0 : i32
    %c0_i32_1 = arith.constant 0 : i32
    return %c0_i32, %c0_i32_0 : i32, i32
  }
  func.func @transform_4(%arg0: i32) -> (i32, i32) {
    %c0_i32 = arith.constant 0 : i32
    %c0_i32_0 = arith.constant 0 : i32
    %c0_i32_1 = arith.constant 0 : i32
    return %c0_i32, %c0_i32_0 : i32, i32
  }
  func.func @transform_5(%arg0: i32) -> (i32, i32) {
    %c0_i32 = arith.constant 0 : i32
    %c0_i32_0 = arith.constant 0 : i32
    %c0_i32_1 = arith.constant 0 : i32
    return %c0_i32, %c0_i32_0 : i32, i32
  }
  func.func @transform_6(%arg0: i32) -> (i32, i32) {
    %c0_i32 = arith.constant 0 : i32
    %c0_i32_0 = arith.constant 0 : i32
    %c0_i32_1 = arith.constant 0 : i32
    return %c0_i32, %c0_i32_0 : i32, i32
  }
  func.func @transform_7(%arg0: i32) -> (i32, i32) {
    %c0_i32 = arith.constant 0 : i32
    %c0_i32_0 = arith.constant 0 : i32
    %c0_i32_1 = arith.constant 0 : i32
    return %c0_i32, %c0_i32_0 : i32, i32
  }
  func.func @transform_8(%arg0: i32) -> (i32, i32) {
    %c0_i32 = arith.constant 0 : i32
    %c0_i32_0 = arith.constant 0 : i32
    %c0_i32_1 = arith.constant 0 : i32
    return %c0_i32, %c0_i32_0 : i32, i32
  }
  func.func @transform_9(%arg0: i32) -> (i32, i32) {
    %c0_i32 = arith.constant 0 : i32
    %c0_i32_0 = arith.constant 0 : i32
    return %c0_i32, %arg0 : i32, i32
  }
}

</mosaic_0001>

<bundles_post_ra>
// kernel: tpu_custom_call.1
= control target key start
LH: loop header
LB: loop body
LE: loop exit
PB: predicated region body
PF: predicated region fallthrough
CT: control target
= control target key end

     0   :  { %14 = vsyncpa [#allocation3], 0  ;;  %s1385_s0 = inlined_call_operand.vmem [shape: f32[2,512], index: 0, kind: input, shape index: {}]   ;;  %s1386_s1 = inlined_call_operand.vmem [shape: f32[32,2], index: 1, kind: input, shape index: {}]   ;;  %s1387_s2 = inlined_call_operand.vmem [shape: f32[32,1], index: 2, kind: input, shape index: {}]   ;;  %s1388_s3 = inlined_call_operand.vmem [shape: f32[32,32], index: 3, kind: input, shape index: {}]   ;;  %s1389_s4 = inlined_call_operand.vmem [shape: f32[32,1], index: 4, kind: input, shape index: {}]   ;;  %s1390_s5 = inlined_call_operand.vmem [shape: f32[32,32], index: 5, kind: input, shape index: {}]   ;;  %s1391_s6 = inlined_call_operand.vmem [shape: f32[32,1], index: 6, kind: input, shape index: {}]   ;;  %s1392_s7 = inlined_call_operand.vmem [shape: f32[6,32], index: 7, kind: input, shape index: {}]   ;;  %s1393_s8 = inlined_call_operand.vmem [shape: f32[6,1], index: 8, kind: input, shape index: {}]   ;;  %s1394_s9 = inlined_call_operand.hbm [shape: f32[6,512], index: 9, kind: output, shape index: {}]  }
   0x1   :  { %16 = vsyncpa [#allocation3 + $0x1], 0  ;;  %s1182_s30 = smov 0   ;;  %s1184_s10 = smov 0  }
   0x2   :  { %s1186_s11 = smov 0   ;;  %s1188_s12 = smov 0  }
   0x3 LB: > { %s1203_s13 = sadd.s32 4294967295, %s1127_s12   ;;  %s919_s14 = sadd.s32 4294967294, %s1127_s12   ;;  %s1127_s12 = sphi %s1188_s12, %s1400_s12   ;;  %s1123_s11 = sphi %s1186_s11, %s1399_s11   ;;  %s1119_s10 = sphi %s1184_s10, %s1398_s10   ;;  %s1115_s30 = sphi %s1182_s30, %s1397_s30  }
   0x4   : > { %s1207_s15 = sadd.s32 1, %s1127_s12   ;;  %s223_s16 = sadd.s32 1, %s1123_s11 }
   0x5   : > { %s220_s17 = ssub.s32 %s1127_s12, %s1207_s15  ;;  %p233_p0 = scmp.ne.s32.totalorder %s1123_s11, %s1119_s10 }
   0x6   : > { %p221_p1 = scmp.eq.s32.totalorder %s220_s17, 0  ;;  %p234_p2 = scmp.eq.s32.totalorder %s1203_s13, 1 }
   0x7   : > { %p239_p3 = scmp.ne.s32.totalorder %s1119_s10, %s1115_s30  ;;  %p240_p4 = scmp.eq.s32.totalorder %s919_s14, 1 }
   0x8   : > { %s1218_s18 = scalar_select %p221_p1, %s1123_s11, %s223_s16  }
   0x9   : > { %p1220_p5 = por %p234_p2, %p233_p0  ;;  %p1224_p6 = por %p240_p4, %p239_p3 }
   0xa   : > { %p922_p7 = scmp.ge.s32.totalorder %s1127_s12, 1  ;;  %p291_p8 = scmp.lt.s32.totalorder %s1127_s12, 3 }
   0xc   : > { %p292_p9 = pnand %p922_p7, %p291_p8 }
   0xd   : > { %s924_s21 = sshll.u32 (!%p292_p9), %s1203_s13, 1  ;;  %v1129_v0 = vmov (!%p292_p9), 0.0   ;;  %v339_v1 = vld [vmem:[%s1387_s2] sm:$0xff] (!%p292_p9)  ;;  %v1130_v2 = vmov (!%p292_p9), 0   ;;  %v341_v3 = vld [vmem:[%s1387_s2 + $0x10] sm:$0xff] (!%p292_p9)  ;;  %v340_v4 = vld [vmem:[%s1387_s2 + $0x8] sm:$0xff] (!%p292_p9) }
   0xe   : > { %295 = sbr.rel (%p292_p9) target bundleno = 987 (0x3db), region = 56  ;;  %p328_p10 = scmp.lt.s32.totalorder (!%p292_p9), %s924_s21, 3  ;;  %454 = vmatprep.mubr.f32.mxu0 (!%p292_p9), %v1129_v0  ;;  %466 = vmatprep.mubr.f32.mxu1 (!%p292_p9), %v1129_v0  ;;  %v342_v5 = vld [vmem:[%s1387_s2 + $0x18] sm:$0xff] (!%p292_p9)  ;;  %vm385_vm0 = vcmask (!%p292_p9), 1041408   ;;  %v335_v8 = vld [vmem:[%s1386_s1] sm:$0xff] (!%p292_p9)  ;;  %vm372_vm1 = vcmask (!%p292_p9), 15360  }
   0xf   : > { %1015 = vset.pattern.permute.xlu0 (!%p292_p9), %v1130_v2  ;;  %1016 = vset.pattern.permute.xlu1 (!%p292_p9), %v1130_v2  ;;  %v337_v9 = vld [vmem:[%s1386_s1 + $0x10] sm:$0xff] (!%p292_p9)  ;;  %v491_v10 = vld [vmem:[%s1389_s4] sm:$0xff] (!%p292_p9)  ;;  %v492_v11 = vld [vmem:[%s1389_s4 + $0x8] sm:$0xff] (!%p292_p9)  ;;  %vm515_vm2 = vcmask (!%p292_p9), 261120   ;;  %s947_s17 = sshll.u32 (!%p292_p9), %s1203_s13, 8  ;;  %s1131_s27 = smov (!%p292_p9), [#allocation2]  }
  0x10   : > { %345 = vperm.xlu0 (!%p292_p9), %1015, %v339_v1   ;;  %355 = vperm.xlu1 (!%p292_p9), %1016, %v341_v3   ;;  %v336_v12 = vld [vmem:[%s1386_s1 + $0x8] sm:$0xff] (!%p292_p9)  ;;  %v338_v13 = vld [vmem:[%s1386_s1 + $0x18] sm:$0xff] (!%p292_p9)  ;;  %v493_v14 = vld [vmem:[%s1389_s4 + $0x10] sm:$0xff] (!%p292_p9)  ;;  %s1343_s26 = scalar_lea.hbm (!%p292_p9), %s1394_s9, %s947_s17  ;;  %s1069_s28 = sshll.u32 (!%p292_p9), %s1131_s27, 4  ;;  %s1070_s28 = int_to_ptr.vmem [resolvable:$false] %s1069_s28 }
  0x11   : > { %v494_v15 = vld [vmem:[%s1389_s4 + $0x18] sm:$0xff] (!%p292_p9)  ;;  %v629_v16 = vld [vmem:[%s1391_s6] sm:$0xff] (!%p292_p9)  ;;  %v630_v17 = vld [vmem:[%s1391_s6 + $0x8] sm:$0xff] (!%p292_p9)  ;;  %s1071_s29 = scalar_lea.vmem (!%p292_p9), %s1070_s28, 512 }
  0x12   : > { %v631_v18 = vld [vmem:[%s1391_s6 + $0x10] sm:$0xff] (!%p292_p9)  ;;  %v632_v19 = vld [vmem:[%s1391_s6 + $0x18] sm:$0xff] (!%p292_p9)  ;;  %v763_v20 = vld [vmem:[%s1393_s8] sm:$0x3f] (!%p292_p9) }
  0x13   : > { %v487_v53 = vld [vmem:[%s1388_s3] sm:$0xff] (!%p292_p9)  ;;  %v488_v54 = vld [vmem:[%s1388_s3 + $0x8] sm:$0xff] (!%p292_p9)  ;;  %v489_v55 = vld [vmem:[%s1388_s3 + $0x10] sm:$0xff] (!%p292_p9) }
  0x14   : > { %350 = vperm.xlu0 (!%p292_p9), %1015, %v340_v4   ;;  %360 = vperm.xlu1 (!%p292_p9), %1016, %v342_v5   ;;  %v490_v56 = vld [vmem:[%s1388_s3 + $0x18] sm:$0xff] (!%p292_p9) }
  0x15   : > { %s1402_s21 = smov (!%p328_p10, %s924_s21), 3 }
  0x16   : > { %s925_s14 = sshll.u32 %s1402_s21, 1 }
  0x17   : > { %s331_s22 = scalar_lea.vmem %s1385_s0, %s925_s14  ;;  %s324_s14 = sand.u32 1, %s1119_s10  }
  0x18   : > { %v926_v6 = vld.sshfl [vmem:[%s331_s22] sm:$0x33 pattern:$0x76325410]  ;;  %497 = vperm.xlu0 %1015, %v491_v10   ;;  %502 = vperm.xlu1 %1016, %v492_v11   ;;  %s923_s16 = sshll.u32 %s324_s14, 4  ;;  %s846_s13 = scalar_lea.sflag [#allocation3], %s324_s14 }
  0x19   : > { %v371_v7 = vcombine.high %v926_v6, %v926_v6  ;;  %s326_s22 = scalar_lea.vmem [#allocation2], %s923_s16 }
  0x1a   : > { %s860_s23 = sshll.u32 %s326_s22, 4  ;;  %s1345_s23 = int_to_ptr.vmem [resolvable:$true] %s860_s23 }
  0x1b   : > { %927 = vmatprep.subr.msk.mxu0 %vm385_vm0, %v371_v7  ;;  %972 = vmatprep.subr.msk.mxu1 %vm385_vm0, %v371_v7  ;;  %s1065_s21 = scalar_lea.vmem %s1345_s23, 256  ;;  %p1072_p0 = scmp.lt.s32.totalorder %s1345_s23, %s1070_s28 }
  0x1c   : > { %928 = vmatpush1.msk.msra.mxu0 %vm385_vm0, %v926_v6  ;;  %973 = vmatpush1.msk.msra.mxu1 %vm385_vm0, %v926_v6  ;;  %p1066_p11 = scmp.ne.s32.totalorder %s1345_s23, %s1065_s21  ;;  %p1073_p1 = scmp.lt.s32.totalorder %s1071_s29, %s1065_s21 }
  0x1d   : > { %929 = vmatmul.mubr.msk.f32.vlgmr.msra.gmra.mrb[0].mxu0 %vm372_vm1, %v335_v8  ;;  %931 = vmatmul.mubr.msk.f32.vlgmr.msra.gmra.mrb[0].mxu1 %vm372_vm1, %v337_v9 }
  0x1e   : > { %460 = vmatprep.mubr.f32.mxu0 %v1129_v0  ;;  %472 = vmatprep.mubr.f32.mxu1 %v1129_v0  ;;  %p1067_p12 = pnand %p1066_p11, %p1220_p5  ;;  %p1074_p2 = por %p1073_p1, %p1072_p0 }
  0x1f   : > { %507 = vperm.xlu0 %1015, %v493_v14   ;;  %512 = vperm.xlu1 %1016, %v494_v15  }
  0x20   : > { %p1068_p13 = pneg %p1067_p12 }
  0x21   : > { %930 = vmatmul.mubr.msk.f32.gmra.mrb[2].mxu0 %vm372_vm1, %v336_v12  ;;  %932 = vmatmul.mubr.msk.f32.gmra.mrb[2].mxu1 %vm372_vm1, %v338_v13 }
  0x22   : > { %592 = vmatprep.mubr.f32.mxu1 %v1129_v0  ;;  %729 = vmatprep.mubr.f32.mxu0 %v1129_v0  ;;  %p1075_p3 = pnand %p1074_p2, %p1068_p13 }
  0x23   : > { %635 = vperm.xlu0 %1015, %v629_v16   ;;  %640 = vperm.xlu1 %1016, %v630_v17  }
  0x27   : > { %645 = vperm.xlu0 %1015, %v631_v18   ;;  %650 = vperm.xlu1 %1016, %v632_v19  }
  0x2b   : > { %766 = vperm.xlu0 %1015, %v763_v20  }
  0x8f   : > { %v346_v21 = vpop.permute.xlu0 %345  ;;  %v356_v22 = vpop.permute.xlu1 %355 }
  0x93   : > { %v351_v31 = vpop.permute.xlu0 %350  ;;  %v361_v32 = vpop.permute.xlu1 %360 }
  0x97   : > { %v498_v57 = vpop.permute.xlu0 %497  ;;  %v503_v62 = vpop.permute.xlu1 %502 }
  0x9e   : > { %v508_v4 = vpop.permute.xlu0 %507  ;;  %v513_v9 = vpop.permute.xlu1 %512 }
  0xf0   : > { %v456_v23 = vpop.f32.mrb[0].mxu0  ;;  %v468_v24 = vpop.f32.mrb[0].mxu1 }
  0xf1   : > { %v457_v25 = vadd.f32 %v456_v23, %v346_v21  ;;  %v458_v26 = vpop.f32.mrb[1].mxu0  ;;  %v469_v27 = vadd.f32 %v468_v24, %v356_v22  ;;  %v470_v28 = vpop.f32.mrb[1].mxu1 }
  0xf2   : > { %v459_v29 = vadd.f32 %v458_v26, %v346_v21  ;;  %v471_v30 = vadd.f32 %v470_v28, %v356_v22  ;;  %v625_v26 = vld [vmem:[%s1390_s5] sm:$0xff]  ;;  %v627_v28 = vld [vmem:[%s1390_s5 + $0x10] sm:$0xff] }
  0xf3   : > { %1017 = vtanh.f32 %v457_v25 }
  0xf4   : > { %1019 = vtanh.f32 %v459_v29  ;;  %v462_v33 = vpop.f32.mrb[2].mxu0  ;;  %v474_v34 = vpop.f32.mrb[2].mxu1  ;;  %v628_v29 = vld [vmem:[%s1390_s5 + $0x18] sm:$0xff] }
  0xf5   : > { %1021 = vtanh.f32 %v469_v27  ;;  %v463_v35 = vadd.f32 %v462_v33, %v351_v31  ;;  %v475_v36 = vadd.f32 %v474_v34, %v361_v32  ;;  %v464_v37 = vpop.f32.mrb[3].mxu0  ;;  %v476_v38 = vpop.f32.mrb[3].mxu1  ;;  %v626_v27 = vld [vmem:[%s1390_s5 + $0x8] sm:$0xff] }
  0xf6   : > { %1023 = vtanh.f32 %v471_v30  ;;  %v465_v39 = vadd.f32 %v464_v37, %v351_v31  ;;  %v477_v40 = vadd.f32 %v476_v38, %v361_v32  ;;  %v636_v30 = vpop.permute.xlu0 %635 }
  0xf7   : > { %1025 = vtanh.f32 %v463_v35  ;;  %v641_v35 = vpop.permute.xlu1 %640 }
  0xf8   : > { %1027 = vtanh.f32 %v475_v36 }
  0xf9   : > { %1029 = vtanh.f32 %v465_v39 }
  0xfa   : > { %1031 = vtanh.f32 %v477_v40 }
  0xfd   : > { %v1018_v41 = vpop.eup %1017 }
  0xfe   : > { %v1020_v42 = vpop.eup %1019 }
  0xff   : > { %v1022_v43 = vpop.eup %1021 }
 0x100   : > { %v1024_v44 = vpop.eup %1023 }
 0x101   : > { %v1026_v45 = vpop.eup %1025 }
 0x102   : > { %v1028_v46 = vpop.eup %1027  ;;  %v950_v47 = vpack.c.bf16 %v1026_v45, %v1018_v41 }
 0x103   : > { %v1030_v48 = vpop.eup %1029  ;;  %v954_v49 = vpack.c.bf16 %v1028_v46, %v1022_v43 }
 0x104   : > { %v1032_v50 = vpop.eup %1031  ;;  %v948_v51 = vpack.c.bf16 %v1030_v48, %v1020_v42 }
 0x105   : > { %v952_v52 = vpack.c.bf16 %v1032_v50, %v1024_v44  ;;  %v651_v44 = vpop.permute.xlu1 %650 }
 0x106   : > { %949 = vmatprep.subr.bf16.mxu1 %v948_v51 }
 0x107   : > { %951 = vmatpush1.bf16.msra.mxu1 %v950_v47 }
 0x108   : > { %953 = vmatprep.subr.bf16.mxu1 %v952_v52 }
 0x10b   : > { %955 = vmatpush1.bf16.msra.mxu1 %v954_v49 }
 0x10e   : > { %933 = vmatmul.mubr.msk.f32.vlgmr.msra.gmra.mrb[4].mxu1 %vm515_vm2, %v487_v53 }
 0x10f   : > { %598 = vmatprep.mubr.f32.mxu1 %v1129_v0 }
 0x112   : > { %934 = vmatmul.mubr.msk.f32.gmra.mrb[6].mxu1 %vm515_vm2, %v488_v54 }
 0x113   : > { %604 = vmatprep.mubr.f32.mxu1 %v1129_v0 }
 0x116   : > { %935 = vmatmul.mubr.msk.f32.gmra.mrb[8].mxu1 %vm515_vm2, %v489_v55 }
 0x117   : > { %610 = vmatprep.mubr.f32.mxu1 %v1129_v0 }
 0x11a   : > { %936 = vmatmul.mubr.msk.f32.gmra.mrb[10].mxu1 %vm515_vm2, %v490_v56 }
 0x11b   : > { %836 = vmatprep.mubr.f32.mxu1 %v1129_v0 }
 0x1e1   : > { %v594_v58 = vpop.f32.mrb[4].mxu1 }
 0x1e2   : > { %v595_v59 = vadd.f32 %v594_v58, %v498_v57  ;;  %v596_v60 = vpop.f32.mrb[5].mxu1 }
 0x1e3   : > { %v597_v61 = vadd.f32 %v596_v60, %v498_v57 }
 0x1e4   : > { %1033 = vtanh.f32 %v595_v59 }
 0x1e5   : > { %v600_v63 = vpop.f32.mrb[6].mxu1  ;;  %1035 = vtanh.f32 %v597_v61  ;;  %v762_v61 = vld [vmem:[%s1392_s7] sm:$0x3f] }
 0x1e6   : > { %v601_v1 = vadd.f32 %v600_v63, %v503_v62  ;;  %v602_v2 = vpop.f32.mrb[7].mxu1 }
 0x1e7   : > { %v603_v3 = vadd.f32 %v602_v2, %v503_v62 }
 0x1e8   : > { %1037 = vtanh.f32 %v601_v1 }
 0x1e9   : > { %1039 = vtanh.f32 %v603_v3  ;;  %v606_v5 = vpop.f32.mrb[8].mxu1 }
 0x1ea   : > { %v607_v6 = vadd.f32 %v606_v5, %v508_v4  ;;  %v608_v7 = vpop.f32.mrb[9].mxu1 }
 0x1eb   : > { %v609_v8 = vadd.f32 %v608_v7, %v508_v4 }
 0x1ec   : > { %1041 = vtanh.f32 %v607_v6 }
 0x1ed   : > { %v612_v10 = vpop.f32.mrb[10].mxu1  ;;  %1043 = vtanh.f32 %v609_v8 }
 0x1ee   : > { %v613_v11 = vadd.f32 %v612_v10, %v513_v9  ;;  %v614_v12 = vpop.f32.mrb[11].mxu1  ;;  %v1034_v14 = vpop.eup %1033 }
 0x1ef   : > { %v615_v13 = vadd.f32 %v614_v12, %v513_v9  ;;  %v1036_v15 = vpop.eup %1035 }
 0x1f0   : > { %1045 = vtanh.f32 %v613_v11 }
 0x1f1   : > { %1047 = vtanh.f32 %v615_v13 }
 0x1f2   : > { %v1038_v16 = vpop.eup %1037 }
 0x1f3   : > { %v1040_v17 = vpop.eup %1039  ;;  %v958_v18 = vpack.c.bf16 %v1038_v16, %v1034_v14 }
 0x1f4   : > { %v956_v19 = vpack.c.bf16 %v1040_v17, %v1036_v15 }
 0x1f6   : > { %957 = vmatprep.subr.bf16.mxu0 %v956_v19  ;;  %v1042_v20 = vpop.eup %1041 }
 0x1f7   : > { %959 = vmatpush1.bf16.msra.mxu0 %v958_v18  ;;  %v1044_v21 = vpop.eup %1043 }
 0x1fa   : > { %v1046_v22 = vpop.eup %1045 }
 0x1fb   : > { %v1048_v23 = vpop.eup %1047  ;;  %v962_v24 = vpack.c.bf16 %v1046_v22, %v1042_v20 }
 0x1fc   : > { %v960_v25 = vpack.c.bf16 %v1048_v23, %v1044_v21 }
 0x1fe   : > { %961 = vmatprep.subr.bf16.mxu0 %v960_v25 }
 0x1ff   : > { %963 = vmatpush1.bf16.msra.mxu0 %v962_v24 }
 0x202   : > { %937 = vmatmul.mubr.msk.f32.vlgmr.msra.gmra.mrb[4].mxu0 %vm515_vm2, %v625_v26 }
 0x203   : > { %735 = vmatprep.mubr.f32.mxu0 %v1129_v0 }
 0x206   : > { %938 = vmatmul.mubr.msk.f32.gmra.mrb[6].mxu0 %vm515_vm2, %v626_v27 }
 0x207   : > { %741 = vmatprep.mubr.f32.mxu0 %v1129_v0 }
 0x20a   : > { %939 = vmatmul.mubr.msk.f32.gmra.mrb[8].mxu0 %vm515_vm2, %v627_v28 }
 0x20b   : > { %747 = vmatprep.mubr.f32.mxu0 %v1129_v0  ;;  %v646_v0 = vpop.permute.xlu0 %645 }
 0x20e   : > { %940 = vmatmul.mubr.msk.f32.gmra.mrb[10].mxu0 %vm515_vm2, %v628_v29 }
 0x20f   : > { %v767_v62 = vpop.permute.xlu0 %766 }
 0x2d5   : > { %v731_v31 = vpop.f32.mrb[4].mxu0 }
 0x2d6   : > { %v732_v32 = vadd.f32 %v731_v31, %v636_v30  ;;  %v733_v33 = vpop.f32.mrb[5].mxu0 }
 0x2d7   : > { %v734_v34 = vadd.f32 %v733_v33, %v636_v30 }
 0x2d8   : > { %1049 = vtanh.f32 %v732_v32 }
 0x2d9   : > { %v737_v36 = vpop.f32.mrb[6].mxu0  ;;  %1051 = vtanh.f32 %v734_v34 }
 0x2da   : > { %v738_v37 = vadd.f32 %v737_v36, %v641_v35  ;;  %v739_v38 = vpop.f32.mrb[7].mxu0 }
 0x2db   : > { %v740_v39 = vadd.f32 %v739_v38, %v641_v35 }
 0x2dc   : > { %1053 = vtanh.f32 %v738_v37 }
 0x2dd   : > { %1055 = vtanh.f32 %v740_v39  ;;  %v743_v40 = vpop.f32.mrb[8].mxu0 }
 0x2de   : > { %v744_v41 = vadd.f32 %v743_v40, %v646_v0  ;;  %v745_v42 = vpop.f32.mrb[9].mxu0 }
 0x2df   : > { %v746_v43 = vadd.f32 %v745_v42, %v646_v0 }
 0x2e0   : > { %1057 = vtanh.f32 %v744_v41 }
 0x2e1   : > { %v749_v45 = vpop.f32.mrb[10].mxu0  ;;  %1059 = vtanh.f32 %v746_v43 }
 0x2e2   : > { %v750_v46 = vadd.f32 %v749_v45, %v651_v44  ;;  %v751_v47 = vpop.f32.mrb[11].mxu0  ;;  %v1050_v49 = vpop.eup %1049 }
 0x2e3   : > { %v752_v48 = vadd.f32 %v751_v47, %v651_v44  ;;  %v1052_v50 = vpop.eup %1051 }
 0x2e4   : > { %1061 = vtanh.f32 %v750_v46 }
 0x2e5   : > { %1063 = vtanh.f32 %v752_v48 }
 0x2e6   : > { %v1054_v51 = vpop.eup %1053 }
 0x2e7   : > { %v1056_v52 = vpop.eup %1055  ;;  %v966_v53 = vpack.c.bf16 %v1054_v51, %v1050_v49 }
 0x2e8   : > { %v964_v54 = vpack.c.bf16 %v1056_v52, %v1052_v50 }
 0x2ea   : > { %965 = vmatprep.subr.bf16.mxu1 %v964_v54  ;;  %v1058_v55 = vpop.eup %1057 }
 0x2eb   : > { %967 = vmatpush1.bf16.msra.mxu1 %v966_v53  ;;  %v1060_v56 = vpop.eup %1059 }
 0x2ee   : > { %v1062_v57 = vpop.eup %1061 }
 0x2ef   : > { %v1064_v58 = vpop.eup %1063  ;;  %v970_v59 = vpack.c.bf16 %v1062_v57, %v1058_v55 }
 0x2f0   : > { %v968_v60 = vpack.c.bf16 %v1064_v58, %v1060_v56 }
 0x2f2   : > { %969 = vmatprep.subr.bf16.mxu1 %v968_v60 }
 0x2f3   : > { %971 = vmatpush1.bf16.msra.mxu1 %v970_v59 }
 0x2f6   : > { %941 = vmatmul.mubr.msk.f32.vlgmr.msra.gmra.mrb[12].mxu1 %vm515_vm2, %v762_v61 }
 0x3c9   : > { %v838_v63 = vpop.f32.mrb[12].mxu1 }
 0x3ca   : > { %v839_v1 = vadd.f32 %v838_v63, %v767_v62  ;;  %v840_v2 = vpop.f32.mrb[13].mxu1 }
 0x3cb   : > { %v841_v3 = vadd.f32 %v840_v2, %v767_v62 }
 0x3cc   : > { %843 = vst [vmem:[%s326_s22] sm:$0x3f] %v839_v1 }
 0x3cd   : > { %844 = vst [vmem:[%s326_s22 + $0x8] sm:$0x3f] %v841_v3 }
 0x3ce   : > { %1078 = shalt.err (!%p1075_p3)
}
 0x3cf   : > { %s1079_s14 = scalar_lea.hbm %s1343_s26, 256  ;;  %s1083_s22 = scalar_lea.hbm %s1394_s9, 512 }
 0x3d0   : > { %p1080_p4 = scmp.ne.s32.totalorder %s1343_s26, %s1079_s14  ;;  %p1084_p9 = scmp.lt.u32.totalorder %s1343_s26, %s1394_s9 }
 0x3d1   : > { %p1085_p10 = scmp.lt.u32.totalorder %s1083_s22, %s1079_s14  ;;  %p1087_p12 = scmp.lt.u32.totalorder %s1079_s14, %s1343_s26 }
 0x3d2   : > { %p1081_p7 = pnand %p1080_p4, %p1220_p5 }
 0x3d3   : > { %p1086_p11 = por %p1085_p10, %p1084_p9 }
 0x3d4   : > { %p1082_p8 = pneg %p1081_p7 }
 0x3d5   : > { %p1088_p13 = por %p1087_p12, %p1086_p11 }
 0x3d7   : > { %p1089_p0 = pnand %p1088_p13, %p1082_p8 }
 0x3d9   : > { %1092 = shalt.err (!%p1089_p0)
}
 0x3da   : > { %974 = dma.vmem_to_hbm [thread:$0]  (%p1220_p5), %s1345_s23, 256, %s1343_s26, %s846_s13  }
 0x3db PF: > { %p980_p1 = scmp.ge.s32.totalorder %s1127_s12, 2  ;;  %s872_s21 = sand.u32 1, %s1115_s30  }
 0x3dc   : > { %s873_s27 = scalar_lea.sflag [#allocation3], %s872_s21 }
 0x3dd   : > { %p977_p2 = pnand %p980_p1, %p1224_p6 }
 0x3df   : > { %1110 = dma.done.wait (!%p977_p2), %s873_s27, 256  }
 0x3e0   : > { %1112 = vsyncadd (!%p977_p2), %s873_s27, 4294967040  ;;  %p19_p3 = scmp.ge.s32.totalorder %s1207_s15, 4   ;;  %s1397_s30 = smov %s1119_s10 }
 0x3e1   : > { %s1398_s10 = smov %s1123_s11  ;;  %s1399_s11 = smov %s1218_s18 }
 0x3e2   : > { %s1400_s12 = smov %s1207_s15  ;;  %21 = sbr.rel (!%p19_p3) target bundleno = 3 (0x3), region = 91 }
 0x3e9   :  { %878 = vsyncpa [#allocation3], 1 }
 0x3ea   :  { %880 = vsyncpa [#allocation3 + $0x1], 1 }

</bundles_post_ra>
